<compile_context>
chip_gen: v7x
topology: tpu7x:2x2x1
jax: 0.10.0
libtpu: 0.0.40
codegen_flags: <defaults>
</compile_context>

<pallas_src>
import jax
import jax.numpy as jnp
from jax.experimental import pallas as pl
from jax.experimental.pallas import tpu as pltpu


def _dense_layer_kernel(x_ref, s1_ref, b1_ref, w1_ref, b2_ref, w2_ref, o_ref):
    # x_ref:  (C_in, L)          one batch element, NCL layout (L on lanes)
    # s1_ref: (C_in, 1)          folded BN1 scale
    # b1_ref: (C_in, 1)          folded BN1 shift
    # w1_ref: (C_mid, C_in)      1x1 conv weight with BN2 scale folded in
    # b2_ref: (C_mid, 1)         folded BN2 shift
    # w2_ref: (3, C_out, C_mid)  k=3 conv weight, tap-major
    # o_ref:  (C_in + C_out, L)  fused concat output
    x = x_ref[...]                                              # (C_in, L)
    c_in, L = x.shape

    # BN1 (folded) + ReLU  -- VPU elementwise
    h1 = jnp.maximum(x * s1_ref[...] + b1_ref[...], 0.0)        # (C_in, L)

    # 1x1 conv (BN2 scale pre-folded) + BN2 shift + ReLU  -- MXU + VPU
    z = jnp.dot(w1_ref[...], h1, preferred_element_type=jnp.float32)   # (C_mid, L)
    h2 = jnp.maximum(z + b2_ref[...], 0.0)

    # k=3 conv, padding=1: per-tap matmuls, then shift results along L (XLU).
    a_prev = jnp.dot(w2_ref[0], h2, preferred_element_type=jnp.float32)  # tap for x[l-1]
    a_mid = jnp.dot(w2_ref[1], h2, preferred_element_type=jnp.float32)   # tap for x[l]
    a_next = jnp.dot(w2_ref[2], h2, preferred_element_type=jnp.float32)  # tap for x[l+1]

    lane = jax.lax.broadcasted_iota(jnp.int32, a_mid.shape, 1)
    # right-shift by 1 (zero at l == 0): contribution of h2[l-1]
    left = jnp.where(lane == 0, 0.0, pltpu.roll(a_prev, shift=1, axis=1))
    # left-shift by 1 expressed as a non-negative circular roll by L-1,
    # with the wrapped lane (l == L-1) masked to zero: contribution of h2[l+1]
    right = jnp.where(lane == L - 1, 0.0, pltpu.roll(a_next, shift=L - 1, axis=1))
    y = a_mid + left + right                                    # (C_out, L)

    # Fused concat([x, y], dim=channel)
    o_ref[:c_in, :] = x.astype(o_ref.dtype)
    o_ref[c_in:, :] = y.astype(o_ref.dtype)


def dense_layer(x_ncl,
                bn1_gamma, bn1_beta, bn1_mean, bn1_var, conv1_w,
                bn2_gamma, bn2_beta, bn2_mean, bn2_var, conv2_w,
                eps=1e-5):
    """x_ncl: (N, C_in, L) f32.
    conv1_w: (C_mid, C_in, 1), conv2_w: (C_out, C_mid, 3) (PyTorch layouts).
    Returns (N, C_in + C_out, L) matching _DenseLayer.forward (BN eval mode)."""
    N, C_in, L = x_ncl.shape
    C_mid = conv1_w.shape[0]
    C_out = conv2_w.shape[0]

    # Fold both BNs (inference semantics / running stats).
    s1 = bn1_gamma / jnp.sqrt(bn1_var + eps)
    sh1 = bn1_beta - bn1_mean * s1
    s2 = bn2_gamma / jnp.sqrt(bn2_var + eps)
    sh2 = bn2_beta - bn2_mean * s2

    w1 = conv1_w[:, :, 0]                        # (C_mid, C_in)
    w1_folded = w1 * s2[:, None]                 # fold BN2 scale into the 1x1 conv
    w2_t = jnp.transpose(conv2_w, (2, 0, 1))     # (3, C_out, C_mid), tap-major

    scale1 = s1.reshape(C_in, 1)
    shift1 = sh1.reshape(C_in, 1)
    shift2 = sh2.reshape(C_mid, 1)

    flops = 2 * N * L * (C_in * C_mid + 3 * C_mid * C_out)
    bytes_accessed = 4 * (N * C_in * L                      # read x
                          + N * (C_in + C_out) * L          # write out
                          + C_mid * C_in + 3 * C_out * C_mid
                          + 2 * C_in + C_mid)

    return pl.pallas_call(
        _dense_layer_kernel,
        out_shape=jax.ShapeDtypeStruct((N, C_in + C_out, L), x_ncl.dtype),
        grid_spec=pltpu.PrefetchScalarGridSpec(
            num_scalar_prefetch=0,
            grid=(N,),
            in_specs=[
                pl.BlockSpec((None, C_in, L), lambda n: (n, 0, 0)),       # x (batch squeezed)
                pl.BlockSpec((C_in, 1), lambda n: (0, 0)),                # BN1 scale
                pl.BlockSpec((C_in, 1), lambda n: (0, 0)),                # BN1 shift
                pl.BlockSpec((C_mid, C_in), lambda n: (0, 0)),            # folded 1x1 weight
                pl.BlockSpec((C_mid, 1), lambda n: (0, 0)),               # BN2 shift
                pl.BlockSpec((3, C_out, C_mid), lambda n: (0, 0, 0)),     # k=3 weight
            ],
            out_specs=pl.BlockSpec((None, C_in + C_out, L), lambda n: (n, 0, 0)),
        ),
        compiler_params=pltpu.CompilerParams(
            dimension_semantics=("parallel",),
            vmem_limit_bytes=64 * 1024 * 1024,
        ),
        cost_estimate=pl.CostEstimate(
            flops=flops, transcendentals=0, bytes_accessed=bytes_accessed),
    )(x_ncl, scale1, shift1, w1_folded, shift2, w2_t)


def _reference(x, g1, b1, m1, v1, w1, g2, b2, m2, v2, w2, eps=1e-5):
    # Pure-JAX reference mirroring the PyTorch module (BN in eval mode, drop_rate=0).
    s1 = g1 / jnp.sqrt(v1 + eps)
    sh1 = b1 - m1 * s1
    h1 = jnp.maximum(x * s1[None, :, None] + sh1[None, :, None], 0.0)
    y1 = jnp.einsum("oi,nil->nol", w1[:, :, 0], h1, precision="highest")
    s2 = g2 / jnp.sqrt(v2 + eps)
    sh2 = b2 - m2 * s2
    h2 = jnp.maximum(y1 * s2[None, :, None] + sh2[None, :, None], 0.0)
    L = x.shape[2]
    h2p = jnp.pad(h2, ((0, 0), (0, 0), (1, 1)))
    y2 = sum(jnp.einsum("oi,nil->nol", w2[:, :, t], h2p[:, :, t:t + L], precision="highest")
             for t in range(3))
    return jnp.concatenate([x, y2], axis=1)


if __name__ == "__main__":
    key = jax.random.PRNGKey(0)
    N = 2
    num_input_features = 32              # C_in
    bn_size, growth_rate = 4, 16         # C_mid = 64, C_out = 16
    L = 128
    C_mid = bn_size * growth_rate
    C_out = growth_rate

    ks = jax.random.split(key, 11)
    x = jax.random.normal(ks[0], (N, num_input_features, L), dtype=jnp.float32)

    # Deterministic synthetic parameters (no checkpoint load).
    g1 = 1.0 + 0.1 * jax.random.normal(ks[1], (num_input_features,), dtype=jnp.float32)
    b1 = 0.1 * jax.random.normal(ks[2], (num_input_features,), dtype=jnp.float32)
    m1 = 0.1 * jax.random.normal(ks[3], (num_input_features,), dtype=jnp.float32)
    v1 = jnp.abs(1.0 + 0.1 * jax.random.normal(ks[4], (num_input_features,), dtype=jnp.float32))

    w1 = jax.random.normal(ks[5], (C_mid, num_input_features, 1), dtype=jnp.float32) \
        * (1.0 / jnp.sqrt(num_input_features))

    g2 = 1.0 + 0.1 * jax.random.normal(ks[6], (C_mid,), dtype=jnp.float32)
    b2 = 0.1 * jax.random.normal(ks[7], (C_mid,), dtype=jnp.float32)
    m2 = 0.1 * jax.random.normal(ks[8], (C_mid,), dtype=jnp.float32)
    v2 = jnp.abs(1.0 + 0.1 * jax.random.normal(ks[9], (C_mid,), dtype=jnp.float32))

    w2 = jax.random.normal(ks[10], (C_out, C_mid, 3), dtype=jnp.float32) \
        * (1.0 / jnp.sqrt(3 * C_mid))

    out = dense_layer(x, g1, b1, m1, v1, w1, g2, b2, m2, v2, w2)
    out = jax.block_until_ready(out)

    ref = _reference(x, g1, b1, m1, v1, w1, g2, b2, m2, v2, w2)
    assert out.shape == (N, num_input_features + C_out, L), out.shape
    max_err = float(jnp.max(jnp.abs(out - ref)))
    assert jnp.allclose(out, ref, atol=2e-3, rtol=2e-3), max_err

    print("KERNEL_OK")
</pallas_src>

<mosaic_0001>
module attributes {stable_mosaic.version = 11 : i64} {
  func.func @_dense_layer_kernel(%arg0: i32, %arg1: memref<1x32x128xf32, #tpu.memory_space<vmem>>, %arg2: memref<32x1xf32, #tpu.memory_space<vmem>>, %arg3: memref<32x1xf32, #tpu.memory_space<vmem>>, %arg4: memref<64x32xf32, #tpu.memory_space<vmem>>, %arg5: memref<64x1xf32, #tpu.memory_space<vmem>>, %arg6: memref<3x16x64xf32, #tpu.memory_space<vmem>>, %arg7: memref<1x48x128xf32, #tpu.memory_space<vmem>>) attributes {dimension_semantics = [#tpu.dimension_semantics<parallel>], iteration_bounds = array<i64: 2>, scalar_prefetch = 0 : i64, scratch_operands = 0 : i64, tpu.core_type = #tpu.core_type<tc>, window_params = [{transform_indices = @transform_0, window_bounds = array<i64: 1, 32, 128>}, {pipeline_mode = #tpu.pipeline_mode<synchronous>, transform_indices = @transform_1, window_bounds = array<i64: 32, 1>}, {pipeline_mode = #tpu.pipeline_mode<synchronous>, transform_indices = @transform_2, window_bounds = array<i64: 32, 1>}, {pipeline_mode = #tpu.pipeline_mode<synchronous>, transform_indices = @transform_3, window_bounds = array<i64: 64, 32>}, {pipeline_mode = #tpu.pipeline_mode<synchronous>, transform_indices = @transform_4, window_bounds = array<i64: 64, 1>}, {pipeline_mode = #tpu.pipeline_mode<synchronous>, transform_indices = @transform_5, window_bounds = array<i64: 3, 16, 64>}, {transform_indices = @transform_6, window_bounds = array<i64: 1, 48, 128>}]} {
    %c0 = arith.constant 0 : index
    %c0_0 = arith.constant 0 : index
    %c0_1 = arith.constant 0 : index
    %0 = vector.load %arg1[%c0, %c0_0, %c0_1] : memref<1x32x128xf32, #tpu.memory_space<vmem>>, vector<1x32x128xf32>
    %1 = vector.shape_cast %0 : vector<1x32x128xf32> to vector<32x128xf32>
    %c0_2 = arith.constant 0 : index
    %c0_3 = arith.constant 0 : index
    %2 = vector.load %arg2[%c0_2, %c0_3] : memref<32x1xf32, #tpu.memory_space<vmem>>, vector<32x1xf32>
    %3 = vector.broadcast %2 : vector<32x1xf32> to vector<32x128xf32>
    %4 = arith.mulf %1, %3 : vector<32x128xf32>
    %c0_4 = arith.constant 0 : index
    %c0_5 = arith.constant 0 : index
    %5 = vector.load %arg3[%c0_4, %c0_5] : memref<32x1xf32, #tpu.memory_space<vmem>>, vector<32x1xf32>
    %6 = vector.broadcast %5 : vector<32x1xf32> to vector<32x128xf32>
    %7 = arith.addf %4, %6 : vector<32x128xf32>
    %cst = arith.constant 0.000000e+00 : f32
    %8 = vector.broadcast %cst : f32 to vector<32x128xf32>
    %9 = arith.maximumf %7, %8 : vector<32x128xf32>
    %c0_6 = arith.constant 0 : index
    %c0_7 = arith.constant 0 : index
    %10 = vector.load %arg4[%c0_6, %c0_7] : memref<64x32xf32, #tpu.memory_space<vmem>>, vector<64x32xf32>
    %cst_8 = arith.constant dense<0.000000e+00> : vector<64x128xf32>
    %11 = tpu.matmul %10, %9, %cst_8 {dimension_numbers = #tpu.dot_dimension_numbers<[1], [0], [0], [1], [0, 0, 1, 1], [], []>} : vector<64x32xf32>, vector<32x128xf32>, vector<64x128xf32> -> vector<64x128xf32>
    %c0_9 = arith.constant 0 : index
    %c0_10 = arith.constant 0 : index
    %12 = vector.load %arg5[%c0_9, %c0_10] : memref<64x1xf32, #tpu.memory_space<vmem>>, vector<64x1xf32>
    %13 = vector.broadcast %12 : vector<64x1xf32> to vector<64x128xf32>
    %14 = arith.addf %11, %13 : vector<64x128xf32>
    %cst_11 = arith.constant 0.000000e+00 : f32
    %15 = vector.broadcast %cst_11 : f32 to vector<64x128xf32>
    %16 = arith.maximumf %14, %15 : vector<64x128xf32>
    %c0_12 = arith.constant 0 : index
    %c0_13 = arith.constant 0 : index
    %c0_14 = arith.constant 0 : index
    %17 = vector.load %arg6[%c0_12, %c0_13, %c0_14] : memref<3x16x64xf32, #tpu.memory_space<vmem>>, vector<1x16x64xf32>
    %18 = vector.shape_cast %17 : vector<1x16x64xf32> to vector<16x64xf32>
    %cst_15 = arith.constant dense<0.000000e+00> : vector<16x128xf32>
    %19 = tpu.matmul %18, %16, %cst_15 {dimension_numbers = #tpu.dot_dimension_numbers<[1], [0], [0], [1], [0, 0, 1, 1], [], []>} : vector<16x64xf32>, vector<64x128xf32>, vector<16x128xf32> -> vector<16x128xf32>
    %c1 = arith.constant 1 : index
    %c0_16 = arith.constant 0 : index
    %c0_17 = arith.constant 0 : index
    %20 = vector.load %arg6[%c1, %c0_16, %c0_17] : memref<3x16x64xf32, #tpu.memory_space<vmem>>, vector<1x16x64xf32>
    %21 = vector.shape_cast %20 : vector<1x16x64xf32> to vector<16x64xf32>
    %cst_18 = arith.constant dense<0.000000e+00> : vector<16x128xf32>
    %22 = tpu.matmul %21, %16, %cst_18 {dimension_numbers = #tpu.dot_dimension_numbers<[1], [0], [0], [1], [0, 0, 1, 1], [], []>} : vector<16x64xf32>, vector<64x128xf32>, vector<16x128xf32> -> vector<16x128xf32>
    %c2 = arith.constant 2 : index
    %c0_19 = arith.constant 0 : index
    %c0_20 = arith.constant 0 : index
    %23 = vector.load %arg6[%c2, %c0_19, %c0_20] : memref<3x16x64xf32, #tpu.memory_space<vmem>>, vector<1x16x64xf32>
    %24 = vector.shape_cast %23 : vector<1x16x64xf32> to vector<16x64xf32>
    %cst_21 = arith.constant dense<0.000000e+00> : vector<16x128xf32>
    %25 = tpu.matmul %24, %16, %cst_21 {dimension_numbers = #tpu.dot_dimension_numbers<[1], [0], [0], [1], [0, 0, 1, 1], [], []>} : vector<16x64xf32>, vector<64x128xf32>, vector<16x128xf32> -> vector<16x128xf32>
    %26 = tpu.iota {dimensions = array<i32: 1>} : vector<16x128xi32>
    %c0_i32 = arith.constant 0 : i32
    %27 = vector.broadcast %c0_i32 : i32 to vector<16x128xi32>
    %28 = arith.cmpi eq, %26, %27 : vector<16x128xi32>
    %c1_i32 = arith.constant 1 : i32
    %29 = tpu.dynamic_rotate %19 by %c1_i32 dim 1 : vector<16x128xf32>, i32 -> vector<16x128xf32>
    %cst_22 = arith.constant 0.000000e+00 : f32
    %30 = vector.broadcast %cst_22 : f32 to vector<16x128xf32>
    %31 = arith.select %28, %30, %29 : vector<16x128xi1>, vector<16x128xf32>
    %c127_i32 = arith.constant 127 : i32
    %32 = vector.broadcast %c127_i32 : i32 to vector<16x128xi32>
    %33 = arith.cmpi eq, %26, %32 : vector<16x128xi32>
    %c127_i32_23 = arith.constant 127 : i32
    %34 = tpu.dynamic_rotate %25 by %c127_i32_23 dim 1 : vector<16x128xf32>, i32 -> vector<16x128xf32>
    %cst_24 = arith.constant 0.000000e+00 : f32
    %35 = vector.broadcast %cst_24 : f32 to vector<16x128xf32>
    %36 = arith.select %33, %35, %34 : vector<16x128xi1>, vector<16x128xf32>
    %37 = arith.addf %22, %31 : vector<16x128xf32>
    %38 = arith.addf %37, %36 : vector<16x128xf32>
    %c0_25 = arith.constant 0 : index
    %c0_26 = arith.constant 0 : index
    %c0_27 = arith.constant 0 : index
    %39 = vector.load %arg7[%c0_25, %c0_26, %c0_27] : memref<1x48x128xf32, #tpu.memory_space<vmem>>, vector<1x32x128xf32>
    %40 = vector.shape_cast %39 : vector<1x32x128xf32> to vector<32x128xf32>
    %41 = vector.shape_cast %1 : vector<32x128xf32> to vector<1x32x128xf32>
    tpu.vector_store %arg7[%c0_25, %c0_26, %c0_27], %41 {strides = array<i32>} : memref<1x48x128xf32, #tpu.memory_space<vmem>>, vector<1x32x128xf32>,
    %c0_28 = arith.constant 0 : index
    %c32 = arith.constant 32 : index
    %c0_29 = arith.constant 0 : index
    %42 = vector.load %arg7[%c0_28, %c32, %c0_29] : memref<1x48x128xf32, #tpu.memory_space<vmem>>, vector<1x16x128xf32>
    %43 = vector.shape_cast %42 : vector<1x16x128xf32> to vector<16x128xf32>
    %44 = vector.shape_cast %38 : vector<16x128xf32> to vector<1x16x128xf32>
    tpu.vector_store %arg7[%c0_28, %c32, %c0_29], %44 {strides = array<i32>} : memref<1x48x128xf32, #tpu.memory_space<vmem>>, vector<1x16x128xf32>,
    return
  }
  func.func @transform_0(%arg0: i32) -> (i32, i32, i32) {
    %c0_i32 = arith.constant 0 : i32
    %c0_i32_0 = arith.constant 0 : i32
    %c0_i32_1 = arith.constant 0 : i32
    return %arg0, %c0_i32, %c0_i32_0 : i32, i32, i32
  }
  func.func @transform_1(%arg0: i32) -> (i32, i32) {
    %c0_i32 = arith.constant 0 : i32
    %c0_i32_0 = arith.constant 0 : i32
    %c0_i32_1 = arith.constant 0 : i32
    return %c0_i32, %c0_i32_0 : i32, i32
  }
  func.func @transform_2(%arg0: i32) -> (i32, i32) {
    %c0_i32 = arith.constant 0 : i32
    %c0_i32_0 = arith.constant 0 : i32
    %c0_i32_1 = arith.constant 0 : i32
    return %c0_i32, %c0_i32_0 : i32, i32
  }
  func.func @transform_3(%arg0: i32) -> (i32, i32) {
    %c0_i32 = arith.constant 0 : i32
    %c0_i32_0 = arith.constant 0 : i32
    %c0_i32_1 = arith.constant 0 : i32
    return %c0_i32, %c0_i32_0 : i32, i32
  }
  func.func @transform_4(%arg0: i32) -> (i32, i32) {
    %c0_i32 = arith.constant 0 : i32
    %c0_i32_0 = arith.constant 0 : i32
    %c0_i32_1 = arith.constant 0 : i32
    return %c0_i32, %c0_i32_0 : i32, i32
  }
  func.func @transform_5(%arg0: i32) -> (i32, i32, i32) {
    %c0_i32 = arith.constant 0 : i32
    %c0_i32_0 = arith.constant 0 : i32
    %c0_i32_1 = arith.constant 0 : i32
    %c0_i32_2 = arith.constant 0 : i32
    return %c0_i32, %c0_i32_0, %c0_i32_1 : i32, i32, i32
  }
  func.func @transform_6(%arg0: i32) -> (i32, i32, i32) {
    %c0_i32 = arith.constant 0 : i32
    %c0_i32_0 = arith.constant 0 : i32
    %c0_i32_1 = arith.constant 0 : i32
    return %arg0, %c0_i32, %c0_i32_0 : i32, i32, i32
  }
}

</mosaic_0001>

<bundles_post_ra>
// kernel: tpu_custom_call.1
= control target key start
LH: loop header
LB: loop body
LE: loop exit
PB: predicated region body
PF: predicated region fallthrough
CT: control target
= control target key end

     0   :  { %11 = vsyncpa [#allocation3], 0  ;;  %s1973_s0 = inlined_call_operand.hbm [shape: f32[2,32,128], index: 0, kind: input, shape index: {}]   ;;  %s1974_s1 = inlined_call_operand.hbm [shape: f32[32,1], index: 1, kind: input, shape index: {}]   ;;  %s1975_s2 = inlined_call_operand.hbm [shape: f32[32,1], index: 2, kind: input, shape index: {}]   ;;  %s1976_s3 = inlined_call_operand.hbm [shape: f32[64,32], index: 3, kind: input, shape index: {}]   ;;  %s1977_s4 = inlined_call_operand.hbm [shape: f32[64,1], index: 4, kind: input, shape index: {}]   ;;  %s1978_s5 = inlined_call_operand.hbm [shape: f32[3,16,64], index: 5, kind: input, shape index: {}]   ;;  %s1979_s6 = inlined_call_operand.hbm [shape: f32[2,48,128], index: 6, kind: output, shape index: {}]  }
   0x1   :  { %13 = vsyncpa [#allocation3 + $0x1], 0 }
   0x2   :  { %14 = vsyncpa [#allocation6], 0 }
   0x3   :  { %15 = vsyncpa [#allocation9], 0 }
   0x4   :  { %16 = vsyncpa [#allocation12], 0 }
   0x5   :  { %17 = vsyncpa [#allocation4], 0 }
   0x6   :  { %19 = vsyncpa [#allocation4 + $0x1], 0  ;;  %s1630_s21 = smov 0   ;;  %s1632_s22 = smov 0  }
   0x7   :  { %s1634_s23 = smov 0   ;;  %s1636_s24 = smov 0  }
   0x8 LB: > { %s1581_s25 = smov [#allocation5]   ;;  %s1651_s27 = sadd.s32 4294967295, %s1579_s24   ;;  %s1579_s24 = sphi %s1636_s24, %s2004_s24   ;;  %s1575_s23 = sphi %s1634_s23, %s2003_s23   ;;  %s1571_s22 = sphi %s1632_s22, %s2002_s22   ;;  %s1567_s21 = sphi %s1630_s21, %s2001_s21  }
   0x9   : > { %s199_s26 = sshll.u32 %s1581_s25, 4  ;;  %p1013_p0 = scmp.ge.s32.totalorder %s1579_s24, 1  ;;  %s1656_s26 = int_to_ptr.vmem [resolvable:$true] %s199_s26 }
   0xa   : > { %p1980_p1 = scmp.eq.s32.totalorder %s1651_s27, 0  ;;  %p187_p2 = scmp.lt.s32.totalorder %s1579_s24, 3 }
   0xb   : > { %s1582_s29 = smov [#allocation8]   ;;  %s1583_s8 = smov [#allocation7]  }
   0xc   : > { %p1658_p3 = pnand %p1013_p0, %p187_p2  ;;  %s225_s30 = sshll.u32 %s1582_s29, 4  ;;  %s1671_s30 = int_to_ptr.vmem [resolvable:$true] %s225_s30 }
   0xd   : > { %s212_s9 = sshll.u32 %s1583_s8, 4  ;;  %s1331_s12 = scalar_lea.hbm %s1974_s1, 512  ;;  %s1673_s9 = int_to_ptr.vmem [resolvable:$true] %s212_s9 }
   0xe   : > { %s1983_s28 = scalar_select %p1658_p3, 1, 0 }
   0xf   : > { %p1249_p5 = pneg %p1658_p3  ;;  %p1332_p7 = scmp.ne.s32.totalorder %s1974_s1, %s1331_s12 }
  0x10   : > { %p1338_p11 = scmp.lt.u32.totalorder %s1331_s12, %s1974_s1 }
  0x11   : > { %p1667_p6 = pnand %p1249_p5, %p1980_p1 }
  0x13   : > { %p1683_p8 = pneg %p1667_p6 }
  0x15   : > { %p1334_p9 = pnand %p1683_p8, %p1332_p7 }
  0x17   : > { %p1335_p10 = pneg %p1334_p9 }
  0x19   : > { %p1340_p12 = pnand %p1338_p11, %p1335_p10 }
  0x1b   : > { %1343 = shalt.err (!%p1340_p12)
}
  0x1c   : > { %s1344_s18 = scalar_lea.vmem %s1656_s26, 512  ;;  %p1352_p5 = scmp.lt.s32.totalorder %s1656_s26, %s1656_s26 }
  0x1d   : > { %p1345_p13 = scmp.ne.s32.totalorder %s1656_s26, %s1344_s18  ;;  %p1353_p4 = scmp.lt.s32.totalorder %s1344_s18, %s1344_s18 }
  0x1f   : > { %p1347_p0 = pnand %p1345_p13, %p1683_p8  ;;  %p1354_p7 = por %p1353_p4, %p1352_p5 }
  0x21   : > { %p1348_p2 = pneg %p1347_p0 }
  0x23   : > { %p1355_p9 = pnand %p1354_p7, %p1348_p2 }
  0x25   : > { %1358 = shalt.err (!%p1355_p9)
}
  0x26   : > { %s1584_s19 = smov 128   ;;  %s1585_s20 = smov 8  }
  0x27   : > { %1252 = dma.hbm_to_vmem [thread:$0]  (!%p1667_p6), %s1974_s1, 512, %s1656_s26, [#allocation6], %s1584_s19, %s1584_s19, %s1585_s20  }
  0x28   : > { %s1359_s11 = scalar_lea.hbm %s1976_s3, 1024 }
  0x29   : > { %p1360_p4 = scmp.ne.s32.totalorder %s1976_s3, %s1359_s11  ;;  %p1366_p12 = scmp.lt.u32.totalorder %s1359_s11, %s1976_s3 }
  0x2b   : > { %p1362_p10 = pnand %p1360_p4, %p1683_p8 }
  0x2d   : > { %p1363_p11 = pneg %p1362_p10 }
  0x2f   : > { %p1368_p13 = pnand %p1366_p12, %p1363_p11 }
  0x31   : > { %1371 = shalt.err (!%p1368_p13)
}
  0x32   : > { %s1372_s26 = scalar_lea.vmem %s1671_s30, 1024  ;;  %p1380_p7 = scmp.lt.s32.totalorder %s1671_s30, %s1671_s30 }
  0x33   : > { %p1373_p0 = scmp.ne.s32.totalorder %s1671_s30, %s1372_s26  ;;  %p1381_p9 = scmp.lt.s32.totalorder %s1372_s26, %s1372_s26 }
  0x35   : > { %p1375_p2 = pnand %p1373_p0, %p1683_p8  ;;  %p1382_p4 = por %p1381_p9, %p1380_p7 }
  0x37   : > { %p1376_p5 = pneg %p1375_p2 }
  0x39   : > { %p1383_p10 = pnand %p1382_p4, %p1376_p5 }
  0x3b   : > { %1386 = shalt.err (!%p1383_p10)
}
  0x3c   : > { %1258 = dma.hbm_to_vmem [thread:$0]  (!%p1667_p6), %s1976_s3, 1024, %s1671_s30, [#allocation9], %s1584_s19, %s1584_s19, %s1585_s20  }
  0x3d   : > { %s1387_s8 = scalar_lea.hbm %s1975_s2, 512 }
  0x3e   : > { %p1388_p11 = scmp.ne.s32.totalorder %s1975_s2, %s1387_s8  ;;  %p1394_p0 = scmp.lt.u32.totalorder %s1387_s8, %s1975_s2 }
  0x40   : > { %p1390_p12 = pnand %p1388_p11, %p1683_p8 }
  0x42   : > { %p1391_p13 = pneg %p1390_p12 }
  0x44   : > { %p1396_p2 = pnand %p1394_p0, %p1391_p13 }
  0x46   : > { %1399 = shalt.err (!%p1396_p2)
}
  0x47   : > { %s1400_s30 = scalar_lea.vmem %s1673_s9, 512  ;;  %p1408_p4 = scmp.lt.s32.totalorder %s1673_s9, %s1673_s9 }
  0x48   : > { %p1401_p5 = scmp.ne.s32.totalorder %s1673_s9, %s1400_s30  ;;  %p1409_p10 = scmp.lt.s32.totalorder %s1400_s30, %s1400_s30 }
  0x4a   : > { %p1403_p7 = pnand %p1401_p5, %p1683_p8  ;;  %p1410_p11 = por %p1409_p10, %p1408_p4 }
  0x4c   : > { %p1404_p9 = pneg %p1403_p7 }
  0x4e   : > { %p1411_p12 = pnand %p1410_p11, %p1404_p9 }
  0x50   : > { %1414 = shalt.err (!%p1411_p12)
}
  0x51   : > { %1255 = dma.hbm_to_vmem [thread:$0]  (!%p1667_p6), %s1975_s2, 512, %s1673_s9, [#allocation6], %s1584_s19, %s1584_s19, %s1585_s20  }
  0x52   : > { %s1586_s26 = smov [#allocation10]   ;;  %s1587_s18 = smov [#allocation11]  }
  0x53   : > { %s238_s17 = sshll.u32 %s1586_s26, 4  ;;  %s251_s25 = sshll.u32 %s1587_s18, 4  ;;  %s239_s17 = int_to_ptr.vmem [resolvable:$true] %s238_s17  ;;  %s252_s25 = int_to_ptr.vmem [resolvable:$true] %s251_s25 }
  0x54   : > { %s1415_s10 = scalar_lea.hbm %s1977_s4, 1024 }
  0x55   : > { %p1416_p13 = scmp.ne.s32.totalorder %s1977_s4, %s1415_s10  ;;  %p1422_p5 = scmp.lt.u32.totalorder %s1415_s10, %s1977_s4 }
  0x57   : > { %p1418_p0 = pnand %p1416_p13, %p1683_p8 }
  0x59   : > { %p1419_p2 = pneg %p1418_p0 }
  0x5b   : > { %p1424_p7 = pnand %p1422_p5, %p1419_p2 }
  0x5d   : > { %1427 = shalt.err (!%p1424_p7)
}
  0x5e   : > { %s1428_s9 = scalar_lea.vmem %s239_s17, 1024  ;;  %p1436_p11 = scmp.lt.s32.totalorder %s239_s17, %s239_s17 }
  0x5f   : > { %p1429_p9 = scmp.ne.s32.totalorder %s239_s17, %s1428_s9  ;;  %p1437_p12 = scmp.lt.s32.totalorder %s1428_s9, %s1428_s9 }
  0x61   : > { %p1431_p4 = pnand %p1429_p9, %p1683_p8  ;;  %p1438_p1 = por %p1437_p12, %p1436_p11 }
  0x63   : > { %p1432_p10 = pneg %p1431_p4 }
  0x65   : > { %p1439_p3 = pnand %p1438_p1, %p1432_p10 }
  0x67   : > { %1442 = shalt.err (!%p1439_p3)
}
  0x68   : > { %1261 = dma.hbm_to_vmem [thread:$0]  (!%p1667_p6), %s1977_s4, 1024, %s239_s17, [#allocation9], %s1584_s19, %s1584_s19, %s1585_s20  }
  0x69   : > { %s1443_s29 = scalar_lea.hbm %s1978_s5, 768 }
  0x6a   : > { %p1444_p1 = scmp.ne.s32.totalorder %s1978_s5, %s1443_s29  ;;  %p1450_p0 = scmp.lt.u32.totalorder %s1443_s29, %s1978_s5 }
  0x6c   : > { %p1446_p3 = pnand %p1444_p1, %p1683_p8 }
  0x6e   : > { %p1447_p13 = pneg %p1446_p3 }
  0x70   : > { %p1452_p2 = pnand %p1450_p0, %p1447_p13 }
  0x72   : > { %1455 = shalt.err (!%p1452_p2)
}
  0x73   : > { %s1456_s13 = scalar_lea.vmem %s252_s25, 768  ;;  %p1464_p4 = scmp.lt.s32.totalorder %s252_s25, %s252_s25 }
  0x74   : > { %p1457_p5 = scmp.ne.s32.totalorder %s252_s25, %s1456_s13  ;;  %p1465_p10 = scmp.lt.s32.totalorder %s1456_s13, %s1456_s13 }
  0x76   : > { %p1459_p7 = pnand %p1457_p5, %p1683_p8  ;;  %p1466_p11 = por %p1465_p10, %p1464_p4 }
  0x78   : > { %p1460_p9 = pneg %p1459_p7 }
  0x7a   : > { %p1467_p12 = pnand %p1466_p11, %p1460_p9 }
  0x7c   : > { %1470 = shalt.err (!%p1467_p12)
}
  0x7d   : > { %1264 = dma.hbm_to_vmem [thread:$0]  (!%p1667_p6), %s1978_s5, 768, %s252_s25, [#allocation12], %s1584_s19, %s1584_s19, %s1585_s20  }
  0x7e   : > { %s1012_s7 = sadd.s32 4294967294, %s1579_s24   ;;  %s1803_s15 = sadd.s32 1, %s1579_s24  }
  0x7f   : > { %s32_s9 = sadd.s32 1, %s1575_s23  ;;  %s29_s14 = ssub.s32 %s1579_s24, %s1803_s15 }
  0x80   : > { %p39_p8 = scmp.ne.s32.totalorder %s1575_s23, %s1571_s22  ;;  %p30_p1 = scmp.eq.s32.totalorder %s29_s14, 0 }
  0x81   : > { %p40_p3 = scmp.eq.s32.totalorder %s1579_s24, 0  ;;  %p45_p13 = scmp.ne.s32.totalorder %s1571_s22, %s1567_s21 }
  0x82   : > { %p174_p0 = scmp.eq.s32.totalorder %s1651_s27, 1  ;;  %p1986_p5 = scmp.eq.s32.totalorder %s1651_s27, 0 }
  0x83   : > { %s1815_s16 = scalar_select %p30_p1, %s1575_s23, %s32_s9  }
  0x84   : > { %p41_p2 = por %p40_p3, %p39_p8  ;;  %p1819_p7 = por %p1986_p5, %p45_p13 }
  0x85   : > { %p1823_p6 = por %p174_p0, %p39_p8  ;;  %p180_p9 = scmp.eq.s32.totalorder %s1012_s7, 1 }
  0x86   : > { %p1278_p4 = scmp.lt.s32.totalorder %s1579_s24, 2  ;;  %s265_s18 = sand.u32 1, %s1575_s23  }
  0x87   : > { %s1988_s25 = scalar_select %p1823_p6, 1, 0 }
  0x88   : > { %p1829_p10 = por %p180_p9, %p45_p13  ;;  %s1020_s8 = sshll.u32 %s265_s18, 5 }
  0x89   : > { %s1047_s10 = sshll.u32 %s1579_s24, 9  ;;  %s269_s17 = scalar_lea.vmem [#allocation2], %s1020_s8 }
  0x8a   : > { %s1989_s29 = scalar_select %p1829_p10, 1, 0 }
  0x8b   : > { %s1837_s13 = scalar_lea.hbm %s1973_s0, %s1047_s10  ;;  %s276_s30 = sshll.u32 %s269_s17, 4  ;;  %s1843_s30 = int_to_ptr.vmem [resolvable:$true] %s276_s30 }
  0x8c   : > { %p1839_p11 = pnand %p1278_p4, %p41_p2  ;;  %s1845_s9 = scalar_lea.sflag [#allocation3], %s265_s18 }
  0x8d   : > { %s1471_s14 = scalar_lea.hbm %s1837_s13, 512  ;;  %s1476_s11 = scalar_lea.hbm %s1973_s0, 1024 }
  0x8e   : > { %p1472_p12 = scmp.ne.s32.totalorder %s1837_s13, %s1471_s14  ;;  %p1473_p8 = pneg %p1839_p11 }
  0x8f   : > { %p1477_p13 = scmp.lt.u32.totalorder %s1837_s13, %s1973_s0  ;;  %p1478_p0 = scmp.lt.u32.totalorder %s1476_s11, %s1471_s14 }
  0x90   : > { %p1474_p1 = pnand %p1473_p8, %p1472_p12  ;;  %p1480_p5 = scmp.lt.u32.totalorder %s1471_s14, %s1837_s13 }
  0x91   : > { %p1479_p2 = por %p1478_p0, %p1477_p13 }
  0x92   : > { %p1475_p3 = pneg %p1474_p1 }
  0x93   : > { %p1481_p9 = por %p1480_p5, %p1479_p2 }
  0x95   : > { %p1482_p4 = pnand %p1481_p9, %p1475_p3 }
  0x97   : > { %1485 = shalt.err (!%p1482_p4)
}
  0x98   : > { %s1486_s18 = scalar_lea.vmem %s1843_s30, 512  ;;  %s1588_s8 = smov [#allocation2]  }
  0x99   : > { %p1487_p12 = scmp.ne.s32.totalorder %s1843_s30, %s1486_s18  ;;  %s1491_s10 = sshll.u32 %s1588_s8, 4  ;;  %s1492_s10 = int_to_ptr.vmem [resolvable:$false] %s1491_s10 }
  0x9a   : > { %s1493_s12 = scalar_lea.vmem %s1492_s10, 1024  ;;  %p1494_p6 = scmp.lt.s32.totalorder %s1843_s30, %s1492_s10 }
  0x9b   : > { %p1489_p1 = pnand %p1487_p12, %p1473_p8  ;;  %p1495_p13 = scmp.lt.s32.totalorder %s1493_s12, %s1486_s18 }
  0x9d   : > { %p1490_p10 = pneg %p1489_p1  ;;  %p1496_p0 = por %p1495_p13, %p1494_p6 }
  0x9f   : > { %p1497_p2 = pnand %p1496_p0, %p1490_p10 }
  0xa1   : > { %1500 = shalt.err (!%p1497_p2)
}
  0xa2   : > { %1268 = dma.hbm_to_vmem [thread:$0]  (!%p1839_p11), %s1837_s13, 512, %s1843_s30, %s1845_s9, %s1584_s19, %s1584_s19, %s1585_s20  }
  0xa3   : > { %p1991_p8 = scmp.ne.s32.totalorder %s1983_s28, 0 }
  0xa4   : > { %s1879_s14 = sand.u32 (!%p1991_p8), 1, %s1571_s22  }
  0xa5   : > { %288 = sbr.rel (%p1991_p8) target bundleno = 920 (0x398), region = 44  ;;  %s1024_s11 = sshll.u32 (!%p1991_p8), %s1879_s14, 5 }
  0xa6   : > { %s291_s17 = scalar_lea.sflag (!%p1991_p8), [#allocation3], %s1879_s14  ;;  %s294_s18 = scalar_lea.vmem (!%p1991_p8), [#allocation2], %s1024_s11 }
  0xac   : > { %1546 = dma.done.wait (%p1819_p7), %s291_s17, 512  }
  0xad   : > { %1548 = vsyncadd (%p1819_p7), %s291_s17, 4294966784  ;;  %p1992_p6 = scmp.eq.s32.totalorder %s1651_s27, 0 }
  0xaf   : > { %1550 = dma.done.wait (%p1992_p6), [#allocation6], 1024   ;;  %p1993_p10 = pmov %p1992_p6 }
  0xb0   : > { %p1994_p11 = pmov %p1992_p6 }
  0xb1   : > { %1552 = vsyncadd (%p1993_p10), [#allocation6], 4294966272 }
  0xb2   : > { %1554 = dma.done.wait (%p1994_p11), [#allocation9], 2048   ;;  %p1995_p3 = pmov %p1992_p6 }
  0xb4   : > { %1556 = vsyncadd (%p1995_p3), [#allocation9], 4294965248  ;;  %p1996_p5 = pmov %p1995_p3 }
  0xb5   : > { %p1997_p9 = pmov %p1995_p3 }
  0xb6   : > { %1558 = dma.done.wait (%p1996_p5), [#allocation12], 768  }
  0xb7   : > { %1560 = vsyncadd (%p1997_p9), [#allocation12], 4294966528  ;;  %v1589_v0 = vmov 0   ;;  %v375_v1 = vld [vmem:[#allocation7] sm:$0xff]  ;;  %s1223_s28 = smul.u32 48, %s1879_s14  ;;  %v376_v3 = vld [vmem:[#allocation7 + $0x8] sm:$0xff] }
  0xb8   : > { %1330 = vset.pattern.permute.xlu1 %v1589_v0  ;;  %1329 = vset.pattern.permute.xlu0 %v1589_v0  ;;  %v347_v2 = vld [vmem:[#allocation5] sm:$0xff]  ;;  %v348_v4 = vld [vmem:[#allocation5 + $0x8] sm:$0xff]  ;;  %v350_v7 = vld [vmem:[#allocation5 + $0x18] sm:$0xff]  ;;  %vm463_vm0 = vcmask 261120   ;;  %vm603_vm1 = vcmask 523264   ;;  %s1590_s20 = smov 1  }
  0xb9   : > { %381 = vperm.xlu1 %1330, %v375_v1   ;;  %353 = vperm.xlu0 %1329, %v347_v2   ;;  %v343_v5 = vld [vmem:[%s294_s18] sm:$0xff]  ;;  %v344_v6 = vld [vmem:[%s294_s18 + $0x8] sm:$0xff]  ;;  %v349_v8 = vld [vmem:[#allocation5 + $0x10] sm:$0xff]  ;;  %s1900_s19 = scalar_lea.vmem [#allocation13], %s1223_s28  ;;  %s1591_s26 = smov 127  }
  0xba   : > { %871 = vst [vmem:[%s1900_s19] sm:$0xff] %v343_v5  ;;  %872 = vst [vmem:[%s1900_s19 + $0x8] sm:$0xff] %v344_v6  ;;  %v346_v9 = vld [vmem:[%s294_s18 + $0x18] sm:$0xff]  ;;  %v345_v10 = vld [vmem:[%s294_s18 + $0x10] sm:$0xff]  ;;  %s891_s13 = sshll.u32 %s1900_s19, 4  ;;  %s1224_s30 = smul.u32 768, %s1651_s27  ;;  %s1922_s13 = int_to_ptr.vmem [resolvable:$true] %s891_s13 }
  0xbb   : > { %874 = vst [vmem:[%s1900_s19 + $0x18] sm:$0xff] %v346_v9  ;;  %873 = vst [vmem:[%s1900_s19 + $0x10] sm:$0xff] %v345_v10  ;;  %v378_v11 = vld [vmem:[#allocation7 + $0x18] sm:$0xff]  ;;  %v377_v12 = vld [vmem:[#allocation7 + $0x10] sm:$0xff]  ;;  %s878_s27 = scalar_lea.sflag [#allocation4], %s1879_s14  ;;  %s1501_s10 = scalar_lea.vmem %s1922_s13, 768 }
  0xbc   : > { %v416_v13 = vld [vmem:[#allocation10 + $0x8] sm:$0xff]  ;;  %v415_v14 = vld [vmem:[#allocation10] sm:$0xff]  ;;  %v418_v15 = vld [vmem:[#allocation10 + $0x18] sm:$0xff]  ;;  %s1927_s8 = scalar_lea.hbm %s1979_s6, %s1224_s30  ;;  %p1502_p7 = scmp.ne.s32.totalorder %s1922_s13, %s1501_s10 }
  0xbd   : > { %386 = vperm.xlu1 %1330, %v376_v3   ;;  %358 = vperm.xlu0 %1329, %v348_v4   ;;  %v417_v16 = vld [vmem:[#allocation10 + $0x10] sm:$0xff]  ;;  %v407_v17 = vld [vmem:[#allocation8] sm:$0xff]  ;;  %v420_v18 = vld [vmem:[#allocation10 + $0x28] sm:$0xff]  ;;  %p1998_p4 = scmp.ne.s32.totalorder %s1988_s25, 0  ;;  %s1592_s12 = smov [#allocation13]  }
  0xbe   : > { %v419_v19 = vld [vmem:[#allocation10 + $0x20] sm:$0xff]  ;;  %1098 = vmatprep.mubr.msk.f32.mxu0 %vm463_vm0, %v407_v17  ;;  %v422_v20 = vld [vmem:[#allocation10 + $0x38] sm:$0xff]  ;;  %v421_v21 = vld [vmem:[#allocation10 + $0x30] sm:$0xff]  ;;  %s1505_s11 = sshll.u32 %s1592_s12, 4  ;;  %s1506_s11 = int_to_ptr.vmem [resolvable:$false] %s1505_s11 }
  0xbf   : > { %v408_v44 = vld [vmem:[#allocation8 + $0x8] sm:$0xff]  ;;  %v409_v45 = vld [vmem:[#allocation8 + $0x10] sm:$0xff]  ;;  %v410_v46 = vld [vmem:[#allocation8 + $0x18] sm:$0xff]  ;;  %p1503_p12 = pnand %p1502_p7, %p1998_p4  ;;  %s1507_s17 = scalar_lea.vmem %s1506_s11, 1536 }
  0xc0   : > { %v411_v47 = vld [vmem:[#allocation8 + $0x20] sm:$0xff]  ;;  %v412_v48 = vld [vmem:[#allocation8 + $0x28] sm:$0xff]  ;;  %v413_v49 = vld [vmem:[#allocation8 + $0x30] sm:$0xff]  ;;  %p1508_p13 = scmp.lt.s32.totalorder %s1922_s13, %s1506_s11  ;;  %p1509_p0 = scmp.lt.s32.totalorder %s1507_s17, %s1501_s10 }
  0xc1   : > { %368 = vperm.xlu1 %1330, %v350_v7   ;;  %363 = vperm.xlu0 %1329, %v349_v8   ;;  %v414_v50 = vld [vmem:[#allocation8 + $0x38] sm:$0xff]  ;;  %v601_v51 = vld [vmem:[#allocation11] sm:$0xff]  ;;  %p1504_p1 = pneg %p1503_p12 }
  0xc2   : > { %1126 = vmatprep.mubr.msk.f32.mxu1 %vm603_vm1, %v601_v51  ;;  %v689_v52 = vld [vmem:[#allocation11 + $0x20] sm:$0xff]  ;;  %p1510_p2 = por %p1509_p0, %p1508_p13 }
  0xc4   : > { %p1511_p8 = pnand %p1510_p2, %p1504_p1 }
  0xc5   : > { %396 = vperm.xlu1 %1330, %v378_v11   ;;  %391 = vperm.xlu0 %1329, %v377_v12  }
  0xc9   : > { %430 = vperm.xlu1 %1330, %v416_v13   ;;  %425 = vperm.xlu0 %1329, %v415_v14  }
  0xcd   : > { %440 = vperm.xlu1 %1330, %v418_v15   ;;  %435 = vperm.xlu0 %1329, %v417_v16  }
  0xd1   : > { %450 = vperm.xlu1 %1330, %v420_v18   ;;  %445 = vperm.xlu0 %1329, %v419_v19  }
  0xd5   : > { %460 = vperm.xlu1 %1330, %v422_v20   ;;  %455 = vperm.xlu0 %1329, %v421_v21  }
 0x138   : > { %v382_v22 = vpop.permute.xlu1 %381  ;;  %v354_v23 = vpop.permute.xlu0 %353 }
 0x139   : > { %v371_v24 = vmul.f32 %v354_v23, %v343_v5 }
 0x13b   : > { %v399_v27 = vadd.f32 %v382_v22, %v371_v24 }
 0x13c   : > { %v387_v25 = vpop.permute.xlu1 %386  ;;  %v359_v26 = vpop.permute.xlu0 %358 }
 0x13d   : > { %v372_v28 = vmul.f32 %v359_v26, %v344_v6  ;;  %v403_v32 = vmax.f32 %v399_v27, 0.0  ;;  %v690_v26 = vld [vmem:[#allocation11 + $0x28] sm:$0xff]  ;;  %v686_v27 = vld [vmem:[#allocation11 + $0x10] sm:$0xff] }
 0x13f   : > { %v400_v29 = vadd.f32 %v387_v25, %v372_v28  ;;  %v602_v25 = vld [vmem:[#allocation11 + $0x8] sm:$0xff]  ;;  %v687_v28 = vld [vmem:[#allocation11 + $0x18] sm:$0xff] }
 0x140   : > { %v369_v30 = vpop.permute.xlu1 %368  ;;  %v364_v31 = vpop.permute.xlu0 %363 }
 0x141   : > { %v404_v33 = vmax.f32 %v400_v29, 0.0  ;;  %v374_v34 = vmul.f32 %v369_v30, %v346_v9  ;;  %v373_v35 = vmul.f32 %v364_v31, %v345_v10 }
 0x143   : > { %v1167_v36 = vpack.c.bf16 %v404_v33, %v403_v32 }
 0x144   : > { %v397_v37 = vpop.permute.xlu1 %396  ;;  %v392_v38 = vpop.permute.xlu0 %391 }
 0x145   : > { %v402_v39 = vadd.f32 %v397_v37, %v374_v34  ;;  %v401_v40 = vadd.f32 %v392_v38, %v373_v35  ;;  %1168 = vmatprep.subr.bf16.mxu0 %v1167_v36  ;;  %v772_v35 = vlaneseq }
 0x146   : > { %1170 = vmatpush3.bf16.msra.mxu0 %v1167_v36 }
 0x147   : > { %v406_v41 = vmax.f32 %v402_v39, 0.0  ;;  %v405_v42 = vmax.f32 %v401_v40, 0.0  ;;  %v773_v36 = vand.u32 127, %v772_v35 }
 0x148   : > { %v431_v53 = vpop.permute.xlu1 %430  ;;  %v426_v54 = vpop.permute.xlu0 %425 }
 0x149   : > { %v1171_v43 = vpack.c.bf16 %v406_v41, %v405_v42  ;;  %vm774_vm2 = vcmp.eq.s32.totalorder %v773_v36, 0  ;;  %vm781_vm3 = vcmp.eq.s32.totalorder %v773_v36, 127 }
 0x14b   : > { %1172 = vmatprep.subr.bf16.mxu0 %v1171_v43 }
 0x14c   : > { %1174 = vmatpush3.bf16.msra.mxu0 %v1171_v43  ;;  %v441_v55 = vpop.permute.xlu1 %440  ;;  %v436_v57 = vpop.permute.xlu0 %435 }
 0x14f   : > { %1099 = vmatmul.mubr.msk.f32.vlgmr.msra.gmra.mrb[0].mxu0 %vm463_vm0, %v408_v44 }
 0x150   : > { %1101 = vmatprep.mubr.msk.f32.mxu0 %vm463_vm0, %v409_v45  ;;  %v451_v2 = vpop.permute.xlu1 %450  ;;  %v446_v5 = vpop.permute.xlu0 %445 }
 0x153   : > { %1102 = vmatmul.mubr.msk.f32.gmra.mrb[2].mxu0 %vm463_vm0, %v410_v46 }
 0x154   : > { %1104 = vmatprep.mubr.msk.f32.mxu0 %vm463_vm0, %v411_v47  ;;  %v461_v14 = vpop.permute.xlu1 %460  ;;  %v456_v17 = vpop.permute.xlu0 %455 }
 0x157   : > { %1105 = vmatmul.mubr.msk.f32.gmra.mrb[4].mxu0 %vm463_vm0, %v412_v48 }
 0x158   : > { %1107 = vmatprep.mubr.msk.f32.mxu0 %vm463_vm0, %v413_v49 }
 0x15b   : > { %1108 = vmatmul.mubr.msk.f32.gmra.mrb[6].mxu0 %vm463_vm0, %v414_v50 }
 0x15c   : > { %1145 = vmatprep.mubr.msk.f32.mxu0 %vm603_vm1, %v689_v52 }
 0x222   : > { %v1100_v56 = vpop.f32.mrb[0].mxu0 }
 0x223   : > { %v560_v58 = vadd.f32 %v1100_v56, %v431_v53  ;;  %v554_v59 = vpop.f32.mrb[1].mxu0 }
 0x224   : > { %v555_v60 = vadd.f32 %v554_v59, %v426_v54 }
 0x225   : > { %v594_v61 = vmax.f32 %v560_v58, 0.0 }
 0x226   : > { %v593_v62 = vmax.f32 %v555_v60, 0.0  ;;  %v1103_v63 = vpop.f32.mrb[2].mxu0 }
 0x227   : > { %v570_v0 = vadd.f32 %v1103_v63, %v441_v55  ;;  %v564_v1 = vpop.f32.mrb[3].mxu0 }
 0x228   : > { %v1175_v3 = vpack.c.bf16 %v594_v61, %v593_v62  ;;  %v565_v4 = vadd.f32 %v564_v1, %v436_v57 }
 0x229   : > { %v596_v6 = vmax.f32 %v570_v0, 0.0 }
 0x22a   : > { %v595_v7 = vmax.f32 %v565_v4, 0.0  ;;  %v1106_v8 = vpop.f32.mrb[4].mxu0  ;;  %1176 = vmatprep.subr.bf16.mxu1 %v1175_v3  ;;  %1192 = vmatprep.subr.bf16.mxu0 %v1175_v3 }
 0x22b   : > { %v580_v9 = vadd.f32 %v1106_v8, %v451_v2  ;;  %v574_v10 = vpop.f32.mrb[5].mxu0  ;;  %1178 = vmatpush3.bf16.msra.mxu1 %v1175_v3  ;;  %1194 = vmatpush3.bf16.msra.mxu0 %v1175_v3 }
 0x22c   : > { %v1179_v11 = vpack.c.bf16 %v596_v6, %v595_v7  ;;  %v575_v12 = vadd.f32 %v574_v10, %v446_v5 }
 0x22d   : > { %v598_v13 = vmax.f32 %v580_v9, 0.0 }
 0x22e   : > { %v597_v15 = vmax.f32 %v575_v12, 0.0  ;;  %v1109_v16 = vpop.f32.mrb[6].mxu0  ;;  %1180 = vmatprep.subr.bf16.mxu1 %v1179_v11  ;;  %1196 = vmatprep.subr.bf16.mxu0 %v1179_v11 }
 0x22f   : > { %v590_v18 = vadd.f32 %v1109_v16, %v461_v14  ;;  %v584_v19 = vpop.f32.mrb[7].mxu0  ;;  %1182 = vmatpush3.bf16.msra.mxu1 %v1179_v11  ;;  %1198 = vmatpush3.bf16.msra.mxu0 %v1179_v11 }
 0x230   : > { %v1183_v20 = vpack.c.bf16 %v598_v13, %v597_v15  ;;  %v585_v21 = vadd.f32 %v584_v19, %v456_v17 }
 0x231   : > { %v600_v22 = vmax.f32 %v590_v18, 0.0 }
 0x232   : > { %v599_v23 = vmax.f32 %v585_v21, 0.0  ;;  %1184 = vmatprep.subr.bf16.mxu1 %v1183_v20  ;;  %1200 = vmatprep.subr.bf16.mxu0 %v1183_v20 }
 0x233   : > { %1186 = vmatpush3.bf16.msra.mxu1 %v1183_v20  ;;  %1202 = vmatpush3.bf16.msra.mxu0 %v1183_v20 }
 0x234   : > { %v1187_v24 = vpack.c.bf16 %v600_v22, %v599_v23 }
 0x236   : > { %1188 = vmatprep.subr.bf16.mxu1 %v1187_v24  ;;  %1204 = vmatprep.subr.bf16.mxu0 %v1187_v24 }
 0x237   : > { %1190 = vmatpush3.bf16.msra.mxu1 %v1187_v24  ;;  %1206 = vmatpush3.bf16.msra.mxu0 %v1187_v24 }
 0x238   : > { %1208 = vmatprep.subr.bf16.mxu1 %v1175_v3 }
 0x23a   : > { %1127 = vmatmul.mubr.msk.f32.vlgmr.msra.gmra.mrb[0].mxu1 %vm603_vm1, %v602_v25  ;;  %1146 = vmatmul.mubr.msk.f32.vlgmr.msra.gmra.mrb[8].mxu0 %vm603_vm1, %v690_v26 }
 0x23b   : > { %1210 = vmatpush3.bf16.msra.mxu1 %v1175_v3  ;;  %1164 = vmatprep.mubr.msk.f32.mxu1 %vm603_vm1, %v686_v27 }
 0x23c   : > { %1212 = vmatprep.subr.bf16.mxu1 %v1179_v11 }
 0x23f   : > { %1214 = vmatpush3.bf16.msra.mxu1 %v1179_v11 }
 0x240   : > { %1216 = vmatprep.subr.bf16.mxu1 %v1183_v20 }
 0x243   : > { %1218 = vmatpush3.bf16.msra.mxu1 %v1183_v20 }
 0x244   : > { %1220 = vmatprep.subr.bf16.mxu1 %v1187_v24 }
 0x247   : > { %1222 = vmatpush3.bf16.msra.mxu1 %v1187_v24 }
 0x24a   : > { %1165 = vmatmul.mubr.msk.f32.vlgmr.msra.gmra.mrb[2].mxu1 %vm603_vm1, %v687_v28 }
 0x30d   : > { %v1128_v29 = vpop.f32.mrb[0].mxu1  ;;  %v1147_v30 = vpop.f32.mrb[8].mxu0 }
 0x30e   : > { %777 = vrot.lane.b32.xlu1 %v1128_v29, %s1590_s20  ;;  %v676_v31 = vpop.f32.mrb[1].mxu1  ;;  %v763_v32 = vpop.f32.mrb[9].mxu0 }
 0x30f   : > { %775 = vrot.lane.b32.xlu0 %v676_v31, %s1590_s20 }
 0x312   : > { %784 = vrot.lane.b32.xlu1 %v1147_v30, %s1591_s26 }
 0x313   : > { %782 = vrot.lane.b32.xlu0 %v763_v32, %s1591_s26 }
 0x31d   : > { %v1166_v33 = vpop.f32.mrb[2].mxu1 }
 0x31e   : > { %v860_v34 = vpop.f32.mrb[3].mxu1 }
 0x380   : > { %v778_v37 = vpop.permute.xlu1 %777 }
 0x381   : > { %v780_v38 = vsel %vm774_vm2, 0.0, %v778_v37  ;;  %v776_v39 = vpop.permute.xlu0 %775 }
 0x382   : > { %v779_v40 = vsel %vm774_vm2, 0.0, %v776_v39  ;;  %v866_v41 = vadd.f32 %v1166_v33, %v780_v38 }
 0x383   : > { %v861_v43 = vadd.f32 %v860_v34, %v779_v40 }
 0x384   : > { %v785_v42 = vpop.permute.xlu1 %784 }
 0x385   : > { %v787_v44 = vsel %vm781_vm3, 0.0, %v785_v42  ;;  %v783_v45 = vpop.permute.xlu0 %782 }
 0x386   : > { %v870_v46 = vadd.f32 %v866_v41, %v787_v44  ;;  %v786_v47 = vsel %vm781_vm3, 0.0, %v783_v45 }
 0x387   : > { %v869_v48 = vadd.f32 %v861_v43, %v786_v47 }
 0x388   : > { %876 = vst [vmem:[%s1900_s19 + $0x28] sm:$0xff] %v870_v46 }
 0x389   : > { %875 = vst [vmem:[%s1900_s19 + $0x20] sm:$0xff] %v869_v48 }
 0x38a   : > { %1514 = shalt.err (!%p1511_p8)
}
 0x38b   : > { %s1515_s18 = scalar_lea.hbm %s1927_s8, 768  ;;  %s1519_s20 = scalar_lea.hbm %s1979_s6, 1536 }
 0x38c   : > { %p1516_p6 = scmp.ne.s32.totalorder %s1927_s8, %s1515_s18  ;;  %p1520_p3 = scmp.lt.u32.totalorder %s1927_s8, %s1979_s6 }
 0x38d   : > { %p1521_p5 = scmp.lt.u32.totalorder %s1519_s20, %s1515_s18  ;;  %p1523_p7 = scmp.lt.u32.totalorder %s1515_s18, %s1927_s8 }
 0x38e   : > { %p1517_p10 = pnand %p1516_p6, %p1998_p4 }
 0x38f   : > { %p1522_p9 = por %p1521_p5, %p1520_p3 }
 0x390   : > { %p1518_p11 = pneg %p1517_p10 }
 0x391   : > { %p1524_p12 = por %p1523_p7, %p1522_p9 }
 0x393   : > { %p1525_p1 = pnand %p1524_p12, %p1518_p11 }
 0x395   : > { %1528 = shalt.err (!%p1525_p1)
}
 0x396   : > { %s1593_s7 = smov 128   ;;  %s1594_s9 = smov 8  }
 0x397   : > { %1247 = dma.vmem_to_hbm [thread:$0]  (%p1998_p4), %s1922_s13, 768, %s1927_s8, %s878_s27, %s1593_s7, %s1593_s7, %s1594_s9  }
 0x398 PF: > { %s906_s10 = sand.u32 1, %s1567_s21   ;;  %p1999_p13 = scmp.ne.s32.totalorder %s1989_s29, 0 }
 0x399   : > { %p2000_p0 = scmp.ge.s32.totalorder %s1579_s24, 2  ;;  %s907_s12 = scalar_lea.sflag [#allocation4], %s906_s10 }
 0x39b   : > { %p1270_p2 = pnand %p2000_p0, %p1999_p13 }
 0x39d   : > { %1562 = dma.done.wait (!%p1270_p2), %s907_s12, 768  }
 0x39e   : > { %1564 = vsyncadd (!%p1270_p2), %s907_s12, 4294966528  ;;  %p22_p8 = scmp.ge.s32.totalorder %s1803_s15, 4   ;;  %s2001_s21 = smov %s1571_s22 }
 0x39f   : > { %s2002_s22 = smov %s1575_s23  ;;  %s2003_s23 = smov %s1815_s16 }
 0x3a0   : > { %s2004_s24 = smov %s1803_s15  ;;  %24 = sbr.rel (!%p22_p8) target bundleno = 8 (0x8), region = 111 }
 0x3a7   :  { %912 = vsyncpa [#allocation3], 1 }
 0x3a8   :  { %914 = vsyncpa [#allocation3 + $0x1], 1 }
 0x3a9   :  { %915 = vsyncpa [#allocation6], 1 }
 0x3aa   :  { %916 = vsyncpa [#allocation9], 1 }
 0x3ab   :  { %917 = vsyncpa [#allocation12], 1 }
 0x3ac   :  { %918 = vsyncpa [#allocation4], 1 }
 0x3ad   :  { %920 = vsyncpa [#allocation4 + $0x1], 1 }

</bundles_post_ra>
